<compile_context>
chip_gen: v5e
topology: v5e:2x2
jax: 0.10.0
libtpu: 0.0.40
codegen_flags: <defaults>
</compile_context>

<pallas_src>
import math
import numpy as np
import jax
import jax.numpy as jnp
from jax import lax
from jax.experimental import pallas as pl
from jax.experimental.pallas import tpu as pltpu

# ----------------------------------------------------------------------------
# Static network configuration (mirrors the auto-builder config)
# ----------------------------------------------------------------------------
N_BATCH = 2
C_IN, C_OUT = 4, 8
H = W = 16                      # conv spatial size (stride 1, pad 1 -> 16x16 out)
KH = KW = 3
HP = WP = 8                     # pooled spatial size (2x2 / stride 2)
F_IN1, F_OUT1 = C_OUT * HP * WP, 32     # 512 -> 32
F_OUT2 = 10

# Batch samples handled per grid step.  1 => grid=(N_BATCH,) "parallel" (v7x 2-TC
# sharding); larger values stack samples into the matmul M dimension per step.
BATCH_BLOCK = 1
assert N_BATCH % BATCH_BLOCK == 0

CONFIG = {
    "layers": [
        {"name": "layer_0_conv2d", "type": "conv2d", "in_channels": C_IN,
         "out_channels": C_OUT, "kernel_size": 3, "stride": 1, "padding": 1, "bias": True},
        {"name": "layer_1_maxpool2d", "type": "maxpool2d", "kernel_size": 2},
        {"name": "layer_2_flatten", "type": "flatten"},
        {"name": "layer_3_linear", "type": "linear", "in_features": F_IN1,
         "out_features": F_OUT1, "bias": True},
        {"name": "layer_4_linear", "type": "linear", "in_features": F_OUT1,
         "out_features": F_OUT2, "bias": True},
    ]
}


# ----------------------------------------------------------------------------
# Parameter init (deterministic, PyTorch-style uniform bounds)
# ----------------------------------------------------------------------------
def init_params(key):
    params = {}
    for cfg in CONFIG["layers"]:
        t, name = cfg["type"], cfg["name"]
        if t == "conv2d":
            cin, cout, k = cfg["in_channels"], cfg["out_channels"], cfg["kernel_size"]
            bound = 1.0 / math.sqrt(cin * k * k)
            key, kw_, kb_ = jax.random.split(key, 3)
            params[name] = {
                "w": jax.random.uniform(kw_, (cout, cin, k, k), jnp.float32, -bound, bound),
                "b": jax.random.uniform(kb_, (cout,), jnp.float32, -bound, bound),
            }
        elif t == "linear":
            fin, fout = cfg["in_features"], cfg["out_features"]
            bound = 1.0 / math.sqrt(fin)
            key, kw_, kb_ = jax.random.split(key, 3)
            params[name] = {
                "w": jax.random.uniform(kw_, (fout, fin), jnp.float32, -bound, bound),
                "b": jax.random.uniform(kb_, (fout,), jnp.float32, -bound, bound),
            }
    return params


# ----------------------------------------------------------------------------
# One-time weight re-layout (done at init, NOT per forward call)
# ----------------------------------------------------------------------------
def prepare_kernel_params(params):
    wc = np.asarray(params["layer_0_conv2d"]["w"], np.float32)   # (Cout, Cin, 3, 3)
    bc = np.asarray(params["layer_0_conv2d"]["b"], np.float32)   # (Cout,)
    w1 = np.asarray(params["layer_3_linear"]["w"], np.float32)   # (32, 512)
    b1 = np.asarray(params["layer_3_linear"]["b"], np.float32)   # (32,)
    w2 = np.asarray(params["layer_4_linear"]["w"], np.float32)   # (10, 32)
    b2 = np.asarray(params["layer_4_linear"]["b"], np.float32)   # (10,)

    # Folded conv RHS: K = (ci, kh, v) with v = input w index, lanes = (w_out, cout).
    # rconv2[(ci*3+kh)*16 + v, j*8 + co] = wc[co, ci, kh, kw] with kw = v - j + 1
    # (kw folded; out-of-range kw absorbs the W padding).  H padding lives in the
    # im2col zero rows built in-kernel.
    rconv2 = np.zeros((C_IN * KH, W, W * C_OUT), np.float32)
    for ci in range(C_IN):
        for kh in range(KH):
            for v in range(W):
                for j in range(W):
                    kw = v - j + 1
                    if 0 <= kw < KW:
                        rconv2[ci * KH + kh, v, j * C_OUT:(j + 1) * C_OUT] = wc[:, ci, kh, kw]
    rconv2 = rconv2.reshape(C_IN * KH * W, W * C_OUT)             # (192, 128)
    bconv = np.tile(bc, W).reshape(1, W * C_OUT)                  # (1, 128): lane j*8+co -> bc[co]

    # MaxPool row selectors (H axis), block-diagonal over the per-step batch block.
    se1 = np.zeros((HP, H), np.float32)
    so1 = np.zeros((HP, H), np.float32)
    for p in range(HP):
        se1[p, 2 * p] = 1.0
        so1[p, 2 * p + 1] = 1.0
    se = np.kron(np.eye(BATCH_BLOCK, dtype=np.float32), se1)      # (B*8, B*16)
    so = np.kron(np.eye(BATCH_BLOCK, dtype=np.float32), so1)

    # MaxPool lane selectors (W axis): lanes (j*8+co) -> (q*8+co), even / odd j.
    sel_e = np.zeros((W, WP), np.float32)
    sel_o = np.zeros((W, WP), np.float32)
    for q in range(WP):
        sel_e[2 * q, q] = 1.0
        sel_o[2 * q + 1, q] = 1.0
    ewe = np.kron(sel_e, np.eye(C_OUT, dtype=np.float32))          # (128, 64)
    ewo = np.kron(sel_o, np.eye(C_OUT, dtype=np.float32))          # (128, 64)

    # Linear-1 with the nn.Flatten (NCHW: f = co*64 + p*8 + q) permutation folded in,
    # matching the kernel's flat layout g = p*64 + q*8 + co:
    #   w1f[p*64 + q*8 + co, o] = w1[o, co*64 + p*8 + q]
    w1f = np.transpose(w1.reshape(F_OUT1, C_OUT, HP, WP), (2, 3, 1, 0)).reshape(F_IN1, F_OUT1)

    return dict(
        rconv2=jnp.asarray(rconv2),
        bconv=jnp.asarray(bconv),
        se=jnp.asarray(se), so=jnp.asarray(so),
        ewe=jnp.asarray(ewe), ewo=jnp.asarray(ewo),
        w1f=jnp.asarray(w1f),                    # (512, 32)
        b1=jnp.asarray(b1.reshape(1, F_OUT1)),   # (1, 32)
        w2t=jnp.asarray(w2.T),                   # (32, 10)
        b2=jnp.asarray(b2.reshape(1, F_OUT2)),   # (1, 10)
    )


# ----------------------------------------------------------------------------
# Fused Pallas kernel: conv -> maxpool -> flatten -> linear -> linear
# ----------------------------------------------------------------------------
def _fused_kernel(x_ref, rconv_ref, bconv_ref, se_ref, so_ref, ewe_ref, ewo_ref,
                  w1f_ref, b1_ref, w2t_ref, b2_ref, out_ref, col_ref, flat_ref):
    zrow = jnp.zeros((1, W), jnp.float32)

    # ---- im2col LHS in VMEM scratch: rows = (sample, h_out), K = (ci, kh, v) ----
    # Every element is written (including the two H-pad zero rows), so no zero-fill.
    for nl in range(BATCH_BLOCK):
        r0 = nl * H
        for ci in range(C_IN):
            xi = x_ref[nl, ci]                                   # (16, 16)
            c0 = ci * KH * W
            # kh = 0 : col[h, v] = x[h-1, v]
            col_ref[r0:r0 + 1, c0:c0 + W] = zrow
            col_ref[r0 + 1:r0 + H, c0:c0 + W] = xi[:H - 1, :]
            # kh = 1 : col[h, v] = x[h, v]
            col_ref[r0:r0 + H, c0 + W:c0 + 2 * W] = xi
            # kh = 2 : col[h, v] = x[h+1, v]
            col_ref[r0:r0 + H - 1, c0 + 2 * W:c0 + 3 * W] = xi[1:, :]
            col_ref[r0 + H - 1:r0 + H, c0 + 2 * W:c0 + 3 * W] = zrow

    # ---- Conv2d as ONE matmul (K = 192) + bias once ----
    y = jnp.dot(col_ref[...], rconv_ref[...], preferred_element_type=jnp.float32)
    y = y + bconv_ref[...]                                        # (B*16, 128), lanes=(w_out, cout)

    # ---- MaxPool2d(2,2): exact max via one-hot selection matmuls ----
    ph = jnp.maximum(
        jnp.dot(se_ref[...], y, preferred_element_type=jnp.float32),
        jnp.dot(so_ref[...], y, preferred_element_type=jnp.float32))    # (B*8, 128)
    pw = jnp.maximum(
        jnp.dot(ph, ewe_ref[...], preferred_element_type=jnp.float32),
        jnp.dot(ph, ewo_ref[...], preferred_element_type=jnp.float32))  # (B*8, 64)

    # ---- Flatten: relayout (8,64) rows -> one 512-lane row per sample ----
    for nl in range(BATCH_BLOCK):
        for p in range(HP):
            flat_ref[nl:nl + 1, p * (WP * C_OUT):(p + 1) * (WP * C_OUT)] = \
                pw[nl * HP + p: nl * HP + p + 1, :]

    # ---- Linear(512->32) + Linear(32->10), one matmul each ----
    z1 = jnp.dot(flat_ref[...], w1f_ref[...], preferred_element_type=jnp.float32) + b1_ref[...]
    z2 = jnp.dot(z1, w2t_ref[...], preferred_element_type=jnp.float32) + b2_ref[...]
    out_ref[:, 0, :] = z2


def _const_spec(shape):
    nd = len(shape)
    return pl.BlockSpec(shape, lambda b, _nd=nd: (0,) * _nd)


@jax.jit
def fused_forward(prep, x):
    """Whole NetworkAutoBuilder forward as a single pallas_call.  x: (2,4,16,16) NCHW."""
    operands = (x, prep["rconv2"], prep["bconv"], prep["se"], prep["so"],
                prep["ewe"], prep["ewo"], prep["w1f"], prep["b1"], prep["w2t"], prep["b2"])
    in_specs = [pl.BlockSpec((BATCH_BLOCK, C_IN, H, W), lambda b: (b, 0, 0, 0))]
    in_specs += [_const_spec(op.shape) for op in operands[1:]]
    out = pl.pallas_call(
        _fused_kernel,
        out_shape=jax.ShapeDtypeStruct((N_BATCH, 1, F_OUT2), jnp.float32),
        grid=(N_BATCH // BATCH_BLOCK,),
        in_specs=in_specs,
        out_specs=pl.BlockSpec((BATCH_BLOCK, 1, F_OUT2), lambda b: (b, 0, 0)),
        scratch_shapes=[
            pltpu.VMEM((BATCH_BLOCK * H, C_IN * KH * W), jnp.float32),   # im2col LHS
            pltpu.VMEM((BATCH_BLOCK, F_IN1), jnp.float32),               # flattened pooled
        ],
        compiler_params=pltpu.CompilerParams(dimension_semantics=("parallel",)),
    )(*operands)
    return out.reshape(N_BATCH, F_OUT2)


# ----------------------------------------------------------------------------
# Pure-JAX reference (mirrors the PyTorch module exactly) for self-checking
# ----------------------------------------------------------------------------
def reference_forward(params, x):
    wc = params["layer_0_conv2d"]["w"]
    bc = params["layer_0_conv2d"]["b"]
    y = lax.conv_general_dilated(x, wc, window_strides=(1, 1), padding=((1, 1), (1, 1)),
                                 dimension_numbers=("NCHW", "OIHW", "NCHW"))
    y = y + bc[None, :, None, None]
    y = lax.reduce_window(y, -jnp.inf, lax.max, (1, 1, 2, 2), (1, 1, 2, 2), "VALID")
    z = y.reshape(y.shape[0], -1)                                   # nn.Flatten on NCHW
    z = z @ params["layer_3_linear"]["w"].T + params["layer_3_linear"]["b"]
    z = z @ params["layer_4_linear"]["w"].T + params["layer_4_linear"]["b"]
    return z


if __name__ == "__main__":
    key = jax.random.PRNGKey(0)
    pkey, xkey = jax.random.split(key)
    params = init_params(pkey)
    prep = prepare_kernel_params(params)               # one-time weight re-layout
    x = jax.random.normal(xkey, (N_BATCH, C_IN, H, W), jnp.float32)   # NCHW, as PyTorch expects

    y = jax.block_until_ready(fused_forward(prep, x))
    assert y.shape == (N_BATCH, F_OUT2) and y.dtype == jnp.float32

    y_ref = jax.block_until_ready(reference_forward(params, x))
    max_err = float(jnp.max(jnp.abs(y - y_ref)))
    assert max_err < 2e-4, f"kernel mismatch vs reference: max abs err = {max_err}"

    print("KERNEL_OK")
</pallas_src>

<mosaic_0001>
module attributes {stable_mosaic.version = 11 : i64} {
  func.func @_fused_kernel(%arg0: i32, %arg1: memref<1x4x16x16xf32, #tpu.memory_space<vmem>>, %arg2: memref<192x128xf32, #tpu.memory_space<vmem>>, %arg3: memref<1x128xf32, #tpu.memory_space<vmem>>, %arg4: memref<8x16xf32, #tpu.memory_space<vmem>>, %arg5: memref<8x16xf32, #tpu.memory_space<vmem>>, %arg6: memref<128x64xf32, #tpu.memory_space<vmem>>, %arg7: memref<128x64xf32, #tpu.memory_space<vmem>>, %arg8: memref<512x32xf32, #tpu.memory_space<vmem>>, %arg9: memref<1x32xf32, #tpu.memory_space<vmem>>, %arg10: memref<32x10xf32, #tpu.memory_space<vmem>>, %arg11: memref<1x10xf32, #tpu.memory_space<vmem>>, %arg12: memref<1x1x10xf32, #tpu.memory_space<vmem>>, %arg13: memref<16x192xf32, #tpu.memory_space<vmem>>, %arg14: memref<1x512xf32, #tpu.memory_space<vmem>>) attributes {dimension_semantics = [#tpu.dimension_semantics<parallel>], iteration_bounds = array<i64: 2>, scalar_prefetch = 0 : i64, scratch_operands = 2 : i64, tpu.core_type = #tpu.core_type<tc>, window_params = [{transform_indices = @transform_0, window_bounds = array<i64: 1, 4, 16, 16>}, {pipeline_mode = #tpu.pipeline_mode<synchronous>, transform_indices = @transform_1, window_bounds = array<i64: 192, 128>}, {pipeline_mode = #tpu.pipeline_mode<synchronous>, transform_indices = @transform_2, window_bounds = array<i64: 1, 128>}, {pipeline_mode = #tpu.pipeline_mode<synchronous>, transform_indices = @transform_3, window_bounds = array<i64: 8, 16>}, {pipeline_mode = #tpu.pipeline_mode<synchronous>, transform_indices = @transform_4, window_bounds = array<i64: 8, 16>}, {pipeline_mode = #tpu.pipeline_mode<synchronous>, transform_indices = @transform_5, window_bounds = array<i64: 128, 64>}, {pipeline_mode = #tpu.pipeline_mode<synchronous>, transform_indices = @transform_6, window_bounds = array<i64: 128, 64>}, {pipeline_mode = #tpu.pipeline_mode<synchronous>, transform_indices = @transform_7, window_bounds = array<i64: 512, 32>}, {pipeline_mode = #tpu.pipeline_mode<synchronous>, transform_indices = @transform_8, window_bounds = array<i64: 1, 32>}, {pipeline_mode = #tpu.pipeline_mode<synchronous>, transform_indices = @transform_9, window_bounds = array<i64: 32, 10>}, {pipeline_mode = #tpu.pipeline_mode<synchronous>, transform_indices = @transform_10, window_bounds = array<i64: 1, 10>}, {transform_indices = @transform_11, window_bounds = array<i64: 1, 1, 10>}]} {
    %cst = arith.constant 0.000000e+00 : f32
    %0 = vector.broadcast %cst : f32 to vector<1x16xf32>
    %c0 = arith.constant 0 : index
    %c0_0 = arith.constant 0 : index
    %c0_1 = arith.constant 0 : index
    %c0_2 = arith.constant 0 : index
    %1 = vector.load %arg1[%c0, %c0_0, %c0_1, %c0_2] : memref<1x4x16x16xf32, #tpu.memory_space<vmem>>, vector<1x1x16x16xf32>
    %2 = vector.shape_cast %1 : vector<1x1x16x16xf32> to vector<16x16xf32>
    %c0_3 = arith.constant 0 : index
    %c0_4 = arith.constant 0 : index
    %3 = vector.load %arg13[%c0_3, %c0_4] : memref<16x192xf32, #tpu.memory_space<vmem>>, vector<1x16xf32>
    tpu.vector_store %arg13[%c0_3, %c0_4], %0 {strides = array<i32>} : memref<16x192xf32, #tpu.memory_space<vmem>>, vector<1x16xf32>,
    %4 = vector.extract_strided_slice %2 {offsets = [0, 0], sizes = [15, 16], strides = [1, 1]} : vector<16x16xf32> to vector<15x16xf32>
    %c1 = arith.constant 1 : index
    %c0_5 = arith.constant 0 : index
    %5 = vector.load %arg13[%c1, %c0_5] : memref<16x192xf32, #tpu.memory_space<vmem>>, vector<15x16xf32>
    tpu.vector_store %arg13[%c1, %c0_5], %4 {strides = array<i32>} : memref<16x192xf32, #tpu.memory_space<vmem>>, vector<15x16xf32>,
    %c0_6 = arith.constant 0 : index
    %c16 = arith.constant 16 : index
    %6 = vector.load %arg13[%c0_6, %c16] : memref<16x192xf32, #tpu.memory_space<vmem>>, vector<16x16xf32>
    tpu.vector_store %arg13[%c0_6, %c16], %2 {strides = array<i32>} : memref<16x192xf32, #tpu.memory_space<vmem>>, vector<16x16xf32>,
    %7 = vector.extract_strided_slice %2 {offsets = [1, 0], sizes = [15, 16], strides = [1, 1]} : vector<16x16xf32> to vector<15x16xf32>
    %c0_7 = arith.constant 0 : index
    %c32 = arith.constant 32 : index
    %8 = vector.load %arg13[%c0_7, %c32] : memref<16x192xf32, #tpu.memory_space<vmem>>, vector<15x16xf32>
    tpu.vector_store %arg13[%c0_7, %c32], %7 {strides = array<i32>} : memref<16x192xf32, #tpu.memory_space<vmem>>, vector<15x16xf32>,
    %c15 = arith.constant 15 : index
    %c32_8 = arith.constant 32 : index
    %9 = vector.load %arg13[%c15, %c32_8] : memref<16x192xf32, #tpu.memory_space<vmem>>, vector<1x16xf32>
    tpu.vector_store %arg13[%c15, %c32_8], %0 {strides = array<i32>} : memref<16x192xf32, #tpu.memory_space<vmem>>, vector<1x16xf32>,
    %c0_9 = arith.constant 0 : index
    %c1_10 = arith.constant 1 : index
    %c0_11 = arith.constant 0 : index
    %c0_12 = arith.constant 0 : index
    %10 = vector.load %arg1[%c0_9, %c1_10, %c0_11, %c0_12] : memref<1x4x16x16xf32, #tpu.memory_space<vmem>>, vector<1x1x16x16xf32>
    %11 = vector.shape_cast %10 : vector<1x1x16x16xf32> to vector<16x16xf32>
    %c0_13 = arith.constant 0 : index
    %c48 = arith.constant 48 : index
    %12 = vector.load %arg13[%c0_13, %c48] : memref<16x192xf32, #tpu.memory_space<vmem>>, vector<1x16xf32>
    tpu.vector_store %arg13[%c0_13, %c48], %0 {strides = array<i32>} : memref<16x192xf32, #tpu.memory_space<vmem>>, vector<1x16xf32>,
    %13 = vector.extract_strided_slice %11 {offsets = [0, 0], sizes = [15, 16], strides = [1, 1]} : vector<16x16xf32> to vector<15x16xf32>
    %c1_14 = arith.constant 1 : index
    %c48_15 = arith.constant 48 : index
    %14 = vector.load %arg13[%c1_14, %c48_15] : memref<16x192xf32, #tpu.memory_space<vmem>>, vector<15x16xf32>
    tpu.vector_store %arg13[%c1_14, %c48_15], %13 {strides = array<i32>} : memref<16x192xf32, #tpu.memory_space<vmem>>, vector<15x16xf32>,
    %c0_16 = arith.constant 0 : index
    %c64 = arith.constant 64 : index
    %15 = vector.load %arg13[%c0_16, %c64] : memref<16x192xf32, #tpu.memory_space<vmem>>, vector<16x16xf32>
    tpu.vector_store %arg13[%c0_16, %c64], %11 {strides = array<i32>} : memref<16x192xf32, #tpu.memory_space<vmem>>, vector<16x16xf32>,
    %16 = vector.extract_strided_slice %11 {offsets = [1, 0], sizes = [15, 16], strides = [1, 1]} : vector<16x16xf32> to vector<15x16xf32>
    %c0_17 = arith.constant 0 : index
    %c80 = arith.constant 80 : index
    %17 = vector.load %arg13[%c0_17, %c80] : memref<16x192xf32, #tpu.memory_space<vmem>>, vector<15x16xf32>
    tpu.vector_store %arg13[%c0_17, %c80], %16 {strides = array<i32>} : memref<16x192xf32, #tpu.memory_space<vmem>>, vector<15x16xf32>,
    %c15_18 = arith.constant 15 : index
    %c80_19 = arith.constant 80 : index
    %18 = vector.load %arg13[%c15_18, %c80_19] : memref<16x192xf32, #tpu.memory_space<vmem>>, vector<1x16xf32>
    tpu.vector_store %arg13[%c15_18, %c80_19], %0 {strides = array<i32>} : memref<16x192xf32, #tpu.memory_space<vmem>>, vector<1x16xf32>,
    %c0_20 = arith.constant 0 : index
    %c2 = arith.constant 2 : index
    %c0_21 = arith.constant 0 : index
    %c0_22 = arith.constant 0 : index
    %19 = vector.load %arg1[%c0_20, %c2, %c0_21, %c0_22] : memref<1x4x16x16xf32, #tpu.memory_space<vmem>>, vector<1x1x16x16xf32>
    %20 = vector.shape_cast %19 : vector<1x1x16x16xf32> to vector<16x16xf32>
    %c0_23 = arith.constant 0 : index
    %c96 = arith.constant 96 : index
    %21 = vector.load %arg13[%c0_23, %c96] : memref<16x192xf32, #tpu.memory_space<vmem>>, vector<1x16xf32>
    tpu.vector_store %arg13[%c0_23, %c96], %0 {strides = array<i32>} : memref<16x192xf32, #tpu.memory_space<vmem>>, vector<1x16xf32>,
    %22 = vector.extract_strided_slice %20 {offsets = [0, 0], sizes = [15, 16], strides = [1, 1]} : vector<16x16xf32> to vector<15x16xf32>
    %c1_24 = arith.constant 1 : index
    %c96_25 = arith.constant 96 : index
    %23 = vector.load %arg13[%c1_24, %c96_25] : memref<16x192xf32, #tpu.memory_space<vmem>>, vector<15x16xf32>
    tpu.vector_store %arg13[%c1_24, %c96_25], %22 {strides = array<i32>} : memref<16x192xf32, #tpu.memory_space<vmem>>, vector<15x16xf32>,
    %c0_26 = arith.constant 0 : index
    %c112 = arith.constant 112 : index
    %24 = vector.load %arg13[%c0_26, %c112] : memref<16x192xf32, #tpu.memory_space<vmem>>, vector<16x16xf32>
    tpu.vector_store %arg13[%c0_26, %c112], %20 {strides = array<i32>} : memref<16x192xf32, #tpu.memory_space<vmem>>, vector<16x16xf32>,
    %25 = vector.extract_strided_slice %20 {offsets = [1, 0], sizes = [15, 16], strides = [1, 1]} : vector<16x16xf32> to vector<15x16xf32>
    %c0_27 = arith.constant 0 : index
    %c128 = arith.constant 128 : index
    %26 = vector.load %arg13[%c0_27, %c128] : memref<16x192xf32, #tpu.memory_space<vmem>>, vector<15x16xf32>
    tpu.vector_store %arg13[%c0_27, %c128], %25 {strides = array<i32>} : memref<16x192xf32, #tpu.memory_space<vmem>>, vector<15x16xf32>,
    %c15_28 = arith.constant 15 : index
    %c128_29 = arith.constant 128 : index
    %27 = vector.load %arg13[%c15_28, %c128_29] : memref<16x192xf32, #tpu.memory_space<vmem>>, vector<1x16xf32>
    tpu.vector_store %arg13[%c15_28, %c128_29], %0 {strides = array<i32>} : memref<16x192xf32, #tpu.memory_space<vmem>>, vector<1x16xf32>,
    %c0_30 = arith.constant 0 : index
    %c3 = arith.constant 3 : index
    %c0_31 = arith.constant 0 : index
    %c0_32 = arith.constant 0 : index
    %28 = vector.load %arg1[%c0_30, %c3, %c0_31, %c0_32] : memref<1x4x16x16xf32, #tpu.memory_space<vmem>>, vector<1x1x16x16xf32>
    %29 = vector.shape_cast %28 : vector<1x1x16x16xf32> to vector<16x16xf32>
    %c0_33 = arith.constant 0 : index
    %c144 = arith.constant 144 : index
    %30 = vector.load %arg13[%c0_33, %c144] : memref<16x192xf32, #tpu.memory_space<vmem>>, vector<1x16xf32>
    tpu.vector_store %arg13[%c0_33, %c144], %0 {strides = array<i32>} : memref<16x192xf32, #tpu.memory_space<vmem>>, vector<1x16xf32>,
    %31 = vector.extract_strided_slice %29 {offsets = [0, 0], sizes = [15, 16], strides = [1, 1]} : vector<16x16xf32> to vector<15x16xf32>
    %c1_34 = arith.constant 1 : index
    %c144_35 = arith.constant 144 : index
    %32 = vector.load %arg13[%c1_34, %c144_35] : memref<16x192xf32, #tpu.memory_space<vmem>>, vector<15x16xf32>
    tpu.vector_store %arg13[%c1_34, %c144_35], %31 {strides = array<i32>} : memref<16x192xf32, #tpu.memory_space<vmem>>, vector<15x16xf32>,
    %c0_36 = arith.constant 0 : index
    %c160 = arith.constant 160 : index
    %33 = vector.load %arg13[%c0_36, %c160] : memref<16x192xf32, #tpu.memory_space<vmem>>, vector<16x16xf32>
    tpu.vector_store %arg13[%c0_36, %c160], %29 {strides = array<i32>} : memref<16x192xf32, #tpu.memory_space<vmem>>, vector<16x16xf32>,
    %34 = vector.extract_strided_slice %29 {offsets = [1, 0], sizes = [15, 16], strides = [1, 1]} : vector<16x16xf32> to vector<15x16xf32>
    %c0_37 = arith.constant 0 : index
    %c176 = arith.constant 176 : index
    %35 = vector.load %arg13[%c0_37, %c176] : memref<16x192xf32, #tpu.memory_space<vmem>>, vector<15x16xf32>
    tpu.vector_store %arg13[%c0_37, %c176], %34 {strides = array<i32>} : memref<16x192xf32, #tpu.memory_space<vmem>>, vector<15x16xf32>,
    %c15_38 = arith.constant 15 : index
    %c176_39 = arith.constant 176 : index
    %36 = vector.load %arg13[%c15_38, %c176_39] : memref<16x192xf32, #tpu.memory_space<vmem>>, vector<1x16xf32>
    tpu.vector_store %arg13[%c15_38, %c176_39], %0 {strides = array<i32>} : memref<16x192xf32, #tpu.memory_space<vmem>>, vector<1x16xf32>,
    %c0_40 = arith.constant 0 : index
    %c0_41 = arith.constant 0 : index
    %37 = vector.load %arg13[%c0_40, %c0_41] : memref<16x192xf32, #tpu.memory_space<vmem>>, vector<16x192xf32>
    %c0_42 = arith.constant 0 : index
    %c0_43 = arith.constant 0 : index
    %38 = vector.load %arg2[%c0_42, %c0_43] : memref<192x128xf32, #tpu.memory_space<vmem>>, vector<192x128xf32>
    %cst_44 = arith.constant dense<0.000000e+00> : vector<16x128xf32>
    %39 = tpu.matmul %37, %38, %cst_44 {dimension_numbers = #tpu.dot_dimension_numbers<[1], [0], [0], [1], [0, 0, 1, 1], [], []>} : vector<16x192xf32>, vector<192x128xf32>, vector<16x128xf32> -> vector<16x128xf32>
    %c0_45 = arith.constant 0 : index
    %c0_46 = arith.constant 0 : index
    %40 = vector.load %arg3[%c0_45, %c0_46] : memref<1x128xf32, #tpu.memory_space<vmem>>, vector<1x128xf32>
    %41 = vector.broadcast %40 : vector<1x128xf32> to vector<16x128xf32>
    %42 = arith.addf %39, %41 : vector<16x128xf32>
    %c0_47 = arith.constant 0 : index
    %c0_48 = arith.constant 0 : index
    %43 = vector.load %arg4[%c0_47, %c0_48] : memref<8x16xf32, #tpu.memory_space<vmem>>, vector<8x16xf32>
    %cst_49 = arith.constant dense<0.000000e+00> : vector<8x128xf32>
    %44 = tpu.matmul %43, %42, %cst_49 {dimension_numbers = #tpu.dot_dimension_numbers<[1], [0], [0], [1], [0, 0, 1, 1], [], []>} : vector<8x16xf32>, vector<16x128xf32>, vector<8x128xf32> -> vector<8x128xf32>
    %c0_50 = arith.constant 0 : index
    %c0_51 = arith.constant 0 : index
    %45 = vector.load %arg5[%c0_50, %c0_51] : memref<8x16xf32, #tpu.memory_space<vmem>>, vector<8x16xf32>
    %cst_52 = arith.constant dense<0.000000e+00> : vector<8x128xf32>
    %46 = tpu.matmul %45, %42, %cst_52 {dimension_numbers = #tpu.dot_dimension_numbers<[1], [0], [0], [1], [0, 0, 1, 1], [], []>} : vector<8x16xf32>, vector<16x128xf32>, vector<8x128xf32> -> vector<8x128xf32>
    %47 = arith.maximumf %44, %46 : vector<8x128xf32>
    %c0_53 = arith.constant 0 : index
    %c0_54 = arith.constant 0 : index
    %48 = vector.load %arg6[%c0_53, %c0_54] : memref<128x64xf32, #tpu.memory_space<vmem>>, vector<128x64xf32>
    %cst_55 = arith.constant dense<0.000000e+00> : vector<8x64xf32>
    %49 = tpu.matmul %47, %48, %cst_55 {dimension_numbers = #tpu.dot_dimension_numbers<[1], [0], [0], [1], [0, 0, 1, 1], [], []>} : vector<8x128xf32>, vector<128x64xf32>, vector<8x64xf32> -> vector<8x64xf32>
    %c0_56 = arith.constant 0 : index
    %c0_57 = arith.constant 0 : index
    %50 = vector.load %arg7[%c0_56, %c0_57] : memref<128x64xf32, #tpu.memory_space<vmem>>, vector<128x64xf32>
    %cst_58 = arith.constant dense<0.000000e+00> : vector<8x64xf32>
    %51 = tpu.matmul %47, %50, %cst_58 {dimension_numbers = #tpu.dot_dimension_numbers<[1], [0], [0], [1], [0, 0, 1, 1], [], []>} : vector<8x128xf32>, vector<128x64xf32>, vector<8x64xf32> -> vector<8x64xf32>
    %52 = arith.maximumf %49, %51 : vector<8x64xf32>
    %53 = vector.extract_strided_slice %52 {offsets = [0, 0], sizes = [1, 64], strides = [1, 1]} : vector<8x64xf32> to vector<1x64xf32>
    %c0_59 = arith.constant 0 : index
    %c0_60 = arith.constant 0 : index
    %54 = vector.load %arg14[%c0_59, %c0_60] : memref<1x512xf32, #tpu.memory_space<vmem>>, vector<1x64xf32>
    tpu.vector_store %arg14[%c0_59, %c0_60], %53 {strides = array<i32>} : memref<1x512xf32, #tpu.memory_space<vmem>>, vector<1x64xf32>,
    %55 = vector.extract_strided_slice %52 {offsets = [1, 0], sizes = [1, 64], strides = [1, 1]} : vector<8x64xf32> to vector<1x64xf32>
    %c0_61 = arith.constant 0 : index
    %c64_62 = arith.constant 64 : index
    %56 = vector.load %arg14[%c0_61, %c64_62] : memref<1x512xf32, #tpu.memory_space<vmem>>, vector<1x64xf32>
    tpu.vector_store %arg14[%c0_61, %c64_62], %55 {strides = array<i32>} : memref<1x512xf32, #tpu.memory_space<vmem>>, vector<1x64xf32>,
    %57 = vector.extract_strided_slice %52 {offsets = [2, 0], sizes = [1, 64], strides = [1, 1]} : vector<8x64xf32> to vector<1x64xf32>
    %c0_63 = arith.constant 0 : index
    %c128_64 = arith.constant 128 : index
    %58 = vector.load %arg14[%c0_63, %c128_64] : memref<1x512xf32, #tpu.memory_space<vmem>>, vector<1x64xf32>
    tpu.vector_store %arg14[%c0_63, %c128_64], %57 {strides = array<i32>} : memref<1x512xf32, #tpu.memory_space<vmem>>, vector<1x64xf32>,
    %59 = vector.extract_strided_slice %52 {offsets = [3, 0], sizes = [1, 64], strides = [1, 1]} : vector<8x64xf32> to vector<1x64xf32>
    %c0_65 = arith.constant 0 : index
    %c192 = arith.constant 192 : index
    %60 = vector.load %arg14[%c0_65, %c192] : memref<1x512xf32, #tpu.memory_space<vmem>>, vector<1x64xf32>
    tpu.vector_store %arg14[%c0_65, %c192], %59 {strides = array<i32>} : memref<1x512xf32, #tpu.memory_space<vmem>>, vector<1x64xf32>,
    %61 = vector.extract_strided_slice %52 {offsets = [4, 0], sizes = [1, 64], strides = [1, 1]} : vector<8x64xf32> to vector<1x64xf32>
    %c0_66 = arith.constant 0 : index
    %c256 = arith.constant 256 : index
    %62 = vector.load %arg14[%c0_66, %c256] : memref<1x512xf32, #tpu.memory_space<vmem>>, vector<1x64xf32>
    tpu.vector_store %arg14[%c0_66, %c256], %61 {strides = array<i32>} : memref<1x512xf32, #tpu.memory_space<vmem>>, vector<1x64xf32>,
    %63 = vector.extract_strided_slice %52 {offsets = [5, 0], sizes = [1, 64], strides = [1, 1]} : vector<8x64xf32> to vector<1x64xf32>
    %c0_67 = arith.constant 0 : index
    %c320 = arith.constant 320 : index
    %64 = vector.load %arg14[%c0_67, %c320] : memref<1x512xf32, #tpu.memory_space<vmem>>, vector<1x64xf32>
    tpu.vector_store %arg14[%c0_67, %c320], %63 {strides = array<i32>} : memref<1x512xf32, #tpu.memory_space<vmem>>, vector<1x64xf32>,
    %65 = vector.extract_strided_slice %52 {offsets = [6, 0], sizes = [1, 64], strides = [1, 1]} : vector<8x64xf32> to vector<1x64xf32>
    %c0_68 = arith.constant 0 : index
    %c384 = arith.constant 384 : index
    %66 = vector.load %arg14[%c0_68, %c384] : memref<1x512xf32, #tpu.memory_space<vmem>>, vector<1x64xf32>
    tpu.vector_store %arg14[%c0_68, %c384], %65 {strides = array<i32>} : memref<1x512xf32, #tpu.memory_space<vmem>>, vector<1x64xf32>,
    %67 = vector.extract_strided_slice %52 {offsets = [7, 0], sizes = [1, 64], strides = [1, 1]} : vector<8x64xf32> to vector<1x64xf32>
    %c0_69 = arith.constant 0 : index
    %c448 = arith.constant 448 : index
    %68 = vector.load %arg14[%c0_69, %c448] : memref<1x512xf32, #tpu.memory_space<vmem>>, vector<1x64xf32>
    tpu.vector_store %arg14[%c0_69, %c448], %67 {strides = array<i32>} : memref<1x512xf32, #tpu.memory_space<vmem>>, vector<1x64xf32>,
    %c0_70 = arith.constant 0 : index
    %c0_71 = arith.constant 0 : index
    %69 = vector.load %arg14[%c0_70, %c0_71] : memref<1x512xf32, #tpu.memory_space<vmem>>, vector<1x512xf32>
    %c0_72 = arith.constant 0 : index
    %c0_73 = arith.constant 0 : index
    %70 = vector.load %arg8[%c0_72, %c0_73] : memref<512x32xf32, #tpu.memory_space<vmem>>, vector<512x32xf32>
    %cst_74 = arith.constant dense<0.000000e+00> : vector<1x32xf32>
    %71 = tpu.matmul %69, %70, %cst_74 {dimension_numbers = #tpu.dot_dimension_numbers<[1], [0], [0], [1], [0, 0, 1, 1], [], []>} : vector<1x512xf32>, vector<512x32xf32>, vector<1x32xf32> -> vector<1x32xf32>
    %c0_75 = arith.constant 0 : index
    %c0_76 = arith.constant 0 : index
    %72 = vector.load %arg9[%c0_75, %c0_76] : memref<1x32xf32, #tpu.memory_space<vmem>>, vector<1x32xf32>
    %73 = arith.addf %71, %72 : vector<1x32xf32>
    %c0_77 = arith.constant 0 : index
    %c0_78 = arith.constant 0 : index
    %74 = vector.load %arg10[%c0_77, %c0_78] : memref<32x10xf32, #tpu.memory_space<vmem>>, vector<32x10xf32>
    %cst_79 = arith.constant dense<0.000000e+00> : vector<1x10xf32>
    %75 = tpu.matmul %73, %74, %cst_79 {dimension_numbers = #tpu.dot_dimension_numbers<[1], [0], [0], [1], [0, 0, 1, 1], [], []>} : vector<1x32xf32>, vector<32x10xf32>, vector<1x10xf32> -> vector<1x10xf32>
    %c0_80 = arith.constant 0 : index
    %c0_81 = arith.constant 0 : index
    %76 = vector.load %arg11[%c0_80, %c0_81] : memref<1x10xf32, #tpu.memory_space<vmem>>, vector<1x10xf32>
    %77 = arith.addf %75, %76 : vector<1x10xf32>
    %c0_82 = arith.constant 0 : index
    %c0_83 = arith.constant 0 : index
    %c0_84 = arith.constant 0 : index
    %78 = vector.load %arg12[%c0_82, %c0_83, %c0_84] : memref<1x1x10xf32, #tpu.memory_space<vmem>>, vector<1x1x10xf32>
    %79 = vector.shape_cast %78 : vector<1x1x10xf32> to vector<1x10xf32>
    %80 = vector.shape_cast %77 : vector<1x10xf32> to vector<1x1x10xf32>
    tpu.vector_store %arg12[%c0_82, %c0_83, %c0_84], %80 {strides = array<i32>} : memref<1x1x10xf32, #tpu.memory_space<vmem>>, vector<1x1x10xf32>,
    return
  }
  func.func @transform_0(%arg0: i32) -> (i32, i32, i32, i32) {
    %c0_i32 = arith.constant 0 : i32
    %c0_i32_0 = arith.constant 0 : i32
    %c0_i32_1 = arith.constant 0 : i32
    %c0_i32_2 = arith.constant 0 : i32
    return %arg0, %c0_i32, %c0_i32_0, %c0_i32_1 : i32, i32, i32, i32
  }
  func.func @transform_1(%arg0: i32) -> (i32, i32) {
    %c0_i32 = arith.constant 0 : i32
    %c0_i32_0 = arith.constant 0 : i32
    %c0_i32_1 = arith.constant 0 : i32
    return %c0_i32, %c0_i32_0 : i32, i32
  }
  func.func @transform_2(%arg0: i32) -> (i32, i32) {
    %c0_i32 = arith.constant 0 : i32
    %c0_i32_0 = arith.constant 0 : i32
    %c0_i32_1 = arith.constant 0 : i32
    return %c0_i32, %c0_i32_0 : i32, i32
  }
  func.func @transform_3(%arg0: i32) -> (i32, i32) {
    %c0_i32 = arith.constant 0 : i32
    %c0_i32_0 = arith.constant 0 : i32
    %c0_i32_1 = arith.constant 0 : i32
    return %c0_i32, %c0_i32_0 : i32, i32
  }
  func.func @transform_4(%arg0: i32) -> (i32, i32) {
    %c0_i32 = arith.constant 0 : i32
    %c0_i32_0 = arith.constant 0 : i32
    %c0_i32_1 = arith.constant 0 : i32
    return %c0_i32, %c0_i32_0 : i32, i32
  }
  func.func @transform_5(%arg0: i32) -> (i32, i32) {
    %c0_i32 = arith.constant 0 : i32
    %c0_i32_0 = arith.constant 0 : i32
    %c0_i32_1 = arith.constant 0 : i32
    return %c0_i32, %c0_i32_0 : i32, i32
  }
  func.func @transform_6(%arg0: i32) -> (i32, i32) {
    %c0_i32 = arith.constant 0 : i32
    %c0_i32_0 = arith.constant 0 : i32
    %c0_i32_1 = arith.constant 0 : i32
    return %c0_i32, %c0_i32_0 : i32, i32
  }
  func.func @transform_7(%arg0: i32) -> (i32, i32) {
    %c0_i32 = arith.constant 0 : i32
    %c0_i32_0 = arith.constant 0 : i32
    %c0_i32_1 = arith.constant 0 : i32
    return %c0_i32, %c0_i32_0 : i32, i32
  }
  func.func @transform_8(%arg0: i32) -> (i32, i32) {
    %c0_i32 = arith.constant 0 : i32
    %c0_i32_0 = arith.constant 0 : i32
    %c0_i32_1 = arith.constant 0 : i32
    return %c0_i32, %c0_i32_0 : i32, i32
  }
  func.func @transform_9(%arg0: i32) -> (i32, i32) {
    %c0_i32 = arith.constant 0 : i32
    %c0_i32_0 = arith.constant 0 : i32
    %c0_i32_1 = arith.constant 0 : i32
    return %c0_i32, %c0_i32_0 : i32, i32
  }
  func.func @transform_10(%arg0: i32) -> (i32, i32) {
    %c0_i32 = arith.constant 0 : i32
    %c0_i32_0 = arith.constant 0 : i32
    %c0_i32_1 = arith.constant 0 : i32
    return %c0_i32, %c0_i32_0 : i32, i32
  }
  func.func @transform_11(%arg0: i32) -> (i32, i32, i32) {
    %c0_i32 = arith.constant 0 : i32
    %c0_i32_0 = arith.constant 0 : i32
    %c0_i32_1 = arith.constant 0 : i32
    return %arg0, %c0_i32, %c0_i32_0 : i32, i32, i32
  }
}

</mosaic_0001>

<bundles_post_ra>
// kernel: fused_forward.1
= control target key start
LH: loop header
LB: loop body
LE: loop exit
PB: predicated region body
PF: predicated region fallthrough
CT: control target
= control target key end

     0   :  { %s1853_s0 = inlined_call_operand.vmem [shape: f32[2,4,16,16], index: 0, kind: input, shape index: {}]   ;;  %s1854_s1 = inlined_call_operand.vmem [shape: f32[192,128], index: 1, kind: input, shape index: {}]   ;;  %s1855_s2 = inlined_call_operand.vmem [shape: f32[1,128], index: 2, kind: input, shape index: {}]   ;;  %s1856_s3 = inlined_call_operand.vmem [shape: f32[8,16], index: 3, kind: input, shape index: {}]   ;;  %s1857_s4 = inlined_call_operand.vmem [shape: f32[8,16], index: 4, kind: input, shape index: {}]   ;;  %s1858_s5 = inlined_call_operand.vmem [shape: f32[128,64], index: 5, kind: input, shape index: {}]   ;;  %s1859_s6 = inlined_call_operand.vmem [shape: f32[128,64], index: 6, kind: input, shape index: {}]   ;;  %s1860_s7 = inlined_call_operand.vmem [shape: f32[512,32], index: 7, kind: input, shape index: {}]   ;;  %s1861_s8 = inlined_call_operand.vmem [shape: f32[1,32], index: 8, kind: input, shape index: {}]   ;;  %s1862_s9 = inlined_call_operand.vmem [shape: f32[32,10], index: 9, kind: input, shape index: {}]   ;;  %s1863_s10 = inlined_call_operand.vmem [shape: f32[1,10], index: 10, kind: input, shape index: {}]   ;;  %s1864_s11 = inlined_call_operand.hbm [shape: f32[2,1,10], index: 11, kind: output, shape index: {}]  }
   0x1   :  { %1874 = sst [smem:[#allocation8_spill]] %s1853_s0 }
   0x2   :  { %16 = vsyncpa [#allocation5], 0 }
   0x3   :  { %18 = vsyncpa [#allocation5 + $0x1], 0  ;;  %s1260_s17 = smov 0   ;;  %s1262_s18 = smov 0  }
   0x4   :  { %s1264_s19 = smov 0   ;;  %s1266_s20 = smov 0  }
   0x5 LB: > { %s1281_s21 = sadd.s32 4294967295, %s1190_s20   ;;  %s1060_s22 = sadd.s32 4294967294, %s1190_s20   ;;  %s1190_s20 = sphi %s1266_s20, %s1892_s20   ;;  %s1186_s19 = sphi %s1264_s19, %s1891_s19   ;;  %s1182_s18 = sphi %s1262_s18, %s1890_s18   ;;  %s1178_s17 = sphi %s1260_s17, %s1889_s17  }
   0x6   : > { %s1285_s23 = sadd.s32 1, %s1190_s20   ;;  %s267_s24 = sadd.s32 1, %s1186_s19 }
   0x7   : > { %s264_s25 = ssub.s32 %s1190_s20, %s1285_s23  ;;  %p277_p0 = scmp.ne.s32.totalorder %s1186_s19, %s1182_s18 }
   0x8   : > { %p265_p1 = scmp.eq.s32.totalorder %s264_s25, 0  ;;  %p278_p2 = scmp.eq.s32.totalorder %s1281_s21, 1 }
   0x9   : > { %p283_p3 = scmp.ne.s32.totalorder %s1182_s18, %s1178_s17  ;;  %p284_p4 = scmp.eq.s32.totalorder %s1060_s22, 1 }
   0xa   : > { %s1296_s26 = scalar_select %p265_p1, %s1186_s19, %s267_s24  }
   0xb   : > { %p1298_p5 = por %p278_p2, %p277_p0  ;;  %p1302_p6 = por %p284_p4, %p283_p3 }
   0xc   : > { %1875 = sst [smem:[#allocation7_spill]] %s1296_s26  ;;  %p1063_p7 = scmp.ge.s32.totalorder %s1190_s20, 1 }
   0xd   : > { %p340_p8 = scmp.lt.s32.totalorder %s1190_s20, 3 }
   0xf   : > { %p341_p9 = pnand %p1063_p7, %p340_p8 }
  0x10   : > { %p379_p10 = scmp.lt.s32.totalorder (!%p341_p9), %s1281_s21, 1  ;;  %s1878_s0 = sld [smem:[#allocation8_spill]] (!%p341_p9) }
  0x11   : > { %344 = sbr.rel (%p341_p9) target bundleno = 1032 (0x408), region = 64  ;;  %s1866_s15 = smov (!%p341_p9), 64  }
  0x12   : > { %s1872_s16 = smov (!%p341_p9), 16   ;;  %s1865_s22 = smov (!%p341_p9), 96  }
  0x13   : > { %s1868_s24 = smov (!%p341_p9), 48   ;;  %s1870_s25 = smov (!%p341_p9), 32  }
  0x14   : > { %s1883_s26 = smov (!%p341_p9), 96  }
  0x16   : > { %s380_s29 = scalar_select %p379_p10, %s1281_s21, 1  ;;  %vm396_vm0 = vcmask 130049   ;;  %vm409_vm1 = vcmask 1046528   ;;  %v566_v17 = vld [vmem:[%s1854_s1 + $0x78] sm:$0xff]  ;;  %v565_v18 = vld [vmem:[%s1854_s1 + $0x70] sm:$0xff]  ;;  %v564_v21 = vld [vmem:[%s1854_s1 + $0x68] sm:$0xff] }
  0x17   : > { %586 = vmatpush.msra.mxu0 %v566_v17  ;;  %v563_v22 = vld [vmem:[%s1854_s1 + $0x60] sm:$0xff]  ;;  %vm390_vm2 = vcmask 1040384   ;;  %vm386_vm3 = vcmask 122880   ;;  %v1199_v31 = vmov 0.0   ;;  %v562_v32 = vld [vmem:[%s1854_s1 + $0x58] sm:$0xff]  ;;  %v561_v33 = vld [vmem:[%s1854_s1 + $0x50] sm:$0xff] }
  0x18   : > { %s1079_s30 = sshll.u32 %s380_s29, 6  ;;  %s1197_s29 = smov 80   ;;  %387 = vst.msk [vmem:[#allocation2] sm:$0x1] %vm386_vm3, %v1199_v31  ;;  %v560_v34 = vld [vmem:[%s1854_s1 + $0x48] sm:$0xff]  ;;  %v559_v35 = vld [vmem:[%s1854_s1 + $0x40] sm:$0xff] }
  0x19   : > { %s1313_s14 = scalar_lea.vmem %s1878_s0, %s1079_s30  ;;  %s1198_s30 = smov 112   ;;  %587 = vmatpush.msra.mxu0 %v565_v18  ;;  %506 = vst.msk [vmem:[#allocation2 + $0x1f] sm:$0x1] %vm386_vm3, %v1199_v31  ;;  %v558_v36 = vld [vmem:[%s1854_s1 + $0x38] sm:$0xff]  ;;  %v557_v39 = vld [vmem:[%s1854_s1 + $0x30] sm:$0xff]  ;;  %v556_v40 = vld [vmem:[%s1854_s1 + $0x28] sm:$0xff] }
  0x1a   : > { %v1066_v0 = vld [vmem:[%s1313_s14 + $0x10] sm:$0xff]  ;;  %v1317_v1 = vld [vmem:[%s1313_s14] sm:$0xff]  ;;  %v1320_v2 = vld [vmem:[%s1313_s14 + $0x8] sm:$0xff]  ;;  %s1882_s0 = smov 64   ;;  %vm398_vm4 = vcmask 130048   ;;  %vm510_vm5 = vcmask 254080  }
  0x1b   : > { %445 = vrot.lane.b32.xlu1 %v1066_v0, %s1866_s15  ;;  %400 = vrot.lane.b32.xlu0 %v1317_v1, %s1872_s16  ;;  %v391_v3 = vrot.slane %v1317_v1, 7  ;;  %v410_v4 = vrot.slane %v1317_v1, 1  ;;  %v411_v5 = vrot.slane %v1320_v2, 1  ;;  %v1329_v6 = vld [vmem:[%s1313_s14 + $0x20] sm:$0xff]  ;;  %v432_v8 = vrot.slane %v1066_v0, 7  ;;  %v1067_v9 = vld [vmem:[%s1313_s14 + $0x18] sm:$0xff] }
  0x1c   : > { %v476_v7 = vrot.slane %v1329_v6, 7  ;;  %v454_v10 = vrot.slane %v1066_v0, 1  ;;  %v455_v12 = vrot.slane %v1067_v9, 1  ;;  %v1070_v13 = vld [vmem:[%s1313_s14 + $0x30] sm:$0xff]  ;;  %v1071_v16 = vld [vmem:[%s1313_s14 + $0x38] sm:$0xff]  ;;  %588 = vmatpush.msra.mxu0 %v564_v21  ;;  %s1880_s15 = smov 48  }
  0x1d   : > { %397 = vst.msk [vmem:[#allocation2] sm:$0xfe] %vm396_vm0, %v391_v3  ;;  %v412_v11 = vsel %vm409_vm1, %v410_v4, %v411_v5  ;;  %v514_v15 = vrot.slane %v1070_v13, 7  ;;  %v534_v19 = vrot.slane %v1070_v13, 1  ;;  %v535_v20 = vrot.slane %v1071_v16, 1  ;;  %v1364_v26 = vld [vmem:[%s1313_s14 + $0x28] sm:$0xff] }
  0x1e   : > { %479 = vrot.lane.b32.xlu2 %v476_v7, %s1865_s22  ;;  %v456_v14 = vsel %vm409_vm1, %v454_v10, %v455_v12  ;;  %589 = vmatpush.msra.mxu0 %v563_v22  ;;  %s1881_s22 = smov 16   ;;  %v433_v24 = vrot.slane %v1067_v9, 7  ;;  %v477_v27 = vrot.slane %v1364_v26, 7  ;;  %v515_v29 = vrot.slane %v1071_v16, 7  ;;  %v555_v41 = vld [vmem:[%s1854_s1 + $0x20] sm:$0xff]  ;;  %v554_v44 = vld [vmem:[%s1854_s1 + $0x18] sm:$0xff] }
  0x1f   : > { %v536_v23 = vsel %vm409_vm1, %v534_v19, %v535_v20  ;;  %v498_v38 = vrot.slane %v1329_v6, 1  ;;  %v499_v42 = vrot.slane %v1364_v26, 1  ;;  %v574_v45 = vld [vmem:[%s1854_s1 + $0xb8] sm:$0xff]  ;;  %v553_v46 = vld [vmem:[%s1854_s1 + $0x10] sm:$0xff]  ;;  %v572_v49 = vld [vmem:[%s1854_s1 + $0xa8] sm:$0xff]  ;;  %v392_v53 = vrot.slane %v1320_v2, 7 }
  0x20   : > { %v434_v25 = vsel %vm390_vm2, %v432_v8, %v433_v24  ;;  %v478_v28 = vsel %vm390_vm2, %v476_v7, %v477_v27  ;;  %v516_v30 = vsel %vm390_vm2, %v514_v15, %v515_v29  ;;  %590 = vmatpush.msra.mxu0 %v562_v32  ;;  %617 = vmatpush.msra.mxu1 %v574_v45  ;;  %v573_v47 = vld [vmem:[%s1854_s1 + $0xb0] sm:$0xff]  ;;  %v552_v50 = vld [vmem:[%s1854_s1 + $0x8] sm:$0xff]  ;;  %v571_v51 = vld [vmem:[%s1854_s1 + $0xa0] sm:$0xff]  ;;  %vm406_vm6 = vcmask 261248  }
  0x21   : > { %v500_v43 = vsel %vm409_vm1, %v498_v38, %v499_v42  ;;  %v551_v52 = vld [vmem:[%s1854_s1] sm:$0xff]  ;;  %v393_v54 = vsel %vm390_vm2, %v391_v3, %v392_v53  ;;  %v570_v55 = vld [vmem:[%s1854_s1 + $0x98] sm:$0xff]  ;;  %v569_v56 = vld [vmem:[%s1854_s1 + $0x90] sm:$0xff]  ;;  %vm419_vm7 = vcmask 392448   ;;  %vm428_vm8 = vcmask 516480  }
  0x22   : > { %591 = vmatpush.msra.mxu0 %v561_v33  ;;  %503 = vst.msk [vmem:[#allocation2 + $0x8] sm:$0xff] %vm398_vm4, %v500_v43  ;;  %618 = vmatpush.msra.mxu1 %v573_v47  ;;  %v568_v58 = vld [vmem:[%s1854_s1 + $0x88] sm:$0xff]  ;;  %v567_v59 = vld [vmem:[%s1854_s1 + $0x80] sm:$0xff]  ;;  %vm441_vm9 = vcmask 523649   ;;  %vm451_vm10 = vcmask 654848   ;;  %vm463_vm11 = vcmask 786048  }
  0x23   : > { %435 = vrot.lane.b32.xlu1 %v432_v8, %s1868_s24  ;;  %413 = vrot.lane.b32.xlu0 %v412_v11, %s1870_s25  ;;  %511 = vst.msk [vmem:[#allocation2 + $0x8] sm:$0x1] %vm510_vm5, %v1199_v31  ;;  %vm472_vm12 = vcmask 910080   ;;  %vm485_vm13 = vcmask 917249   ;;  %vm504_vm14 = vcmask 129024   ;;  %vm523_vm15 = vcmask 261249  }
  0x24   : > { %592 = vmatpush.msra.mxu0 %v560_v34  ;;  %619 = vmatpush.msra.mxu1 %v572_v49  ;;  %399 = vst.msk [vmem:[#allocation2 + $0x10] sm:$0xff] %vm398_vm4, %v393_v54  ;;  %vm495_vm0 = vcmask 1048448   ;;  %vm443_vm1 = vcmask 523648   ;;  %vm423_vm2 = vcmask 385280   ;;  %vm421_vm3 = vcmask 391424   ;;  %v656_v27 = vld [vmem:[%s1857_s4] sm:$0xff] }
  0x25   : > { %505 = vst.msk [vmem:[#allocation2 + $0x18] sm:$0x7f] %vm504_vm14, %v499_v42  ;;  %vm579_vm5 = vcmask 523264   ;;  %v732_v29 = vld [vmem:[%s1859_s6 + $0x78] sm:$0xff]  ;;  %v694_v32 = vld [vmem:[%s1858_s5 + $0x68] sm:$0xff]  ;;  %v693_v34 = vld [vmem:[%s1858_s5 + $0x60] sm:$0xff] }
  0x26   : > { %457 = vrot.lane.b32.xlu2 %v456_v14, %s1197_s29  ;;  %593 = vmatpush.msra.mxu0 %v559_v35  ;;  %v730_v33 = vld [vmem:[%s1859_s6 + $0x68] sm:$0xff]  ;;  %v729_v35 = vld [vmem:[%s1859_s6 + $0x60] sm:$0xff]  ;;  %v691_v38 = vld [vmem:[%s1858_s5 + $0x50] sm:$0xff]  ;;  %vm990_vm14 = vcmask 73728  }
  0x27   : > { %620 = vmatpush.msra.mxu1 %v571_v51  ;;  %v689_v42 = vld [vmem:[%s1858_s5 + $0x40] sm:$0xff]  ;;  %v724_v45 = vld [vmem:[%s1859_s6 + $0x38] sm:$0xff]  ;;  %v723_v47 = vld [vmem:[%s1859_s6 + $0x30] sm:$0xff] }
  0x28   : > { %594 = vmatpush.msra.mxu0 %v558_v36  ;;  %v692_v36 = vld [vmem:[%s1858_s5 + $0x58] sm:$0xff]  ;;  %v725_v43 = vld [vmem:[%s1859_s6 + $0x40] sm:$0xff]  ;;  %v722_v49 = vld [vmem:[%s1859_s6 + $0x28] sm:$0xff] }
  0x29   : > { %621 = vmatpush.msra.mxu1 %v570_v55  ;;  %v721_v51 = vld [vmem:[%s1859_s6 + $0x20] sm:$0xff]  ;;  %v720_v53 = vld [vmem:[%s1859_s6 + $0x18] sm:$0xff]  ;;  %v683_v54 = vld [vmem:[%s1858_s5 + $0x10] sm:$0xff] }
  0x2a   : > { %595 = vmatpush.msra.mxu0 %v557_v39  ;;  %v727_v39 = vld [vmem:[%s1859_s6 + $0x50] sm:$0xff] }
  0x2b   : > { %517 = vrot.lane.b32.xlu1 %v514_v15, %s1872_s16  ;;  %489 = vrot.lane.b32.xlu0 %v1329_v6, %s1198_s30  ;;  %s1879_s16 = smov 32   ;;  %v719_v55 = vld [vmem:[%s1859_s6 + $0x10] sm:$0xff] }
  0x2c   : > { %596 = vmatpush.msra.mxu0 %v556_v40  ;;  %622 = vmatpush.msra.mxu1 %v569_v56  ;;  %v690_v40 = vld [vmem:[%s1858_s5 + $0x48] sm:$0xff] }
  0x2d   : > { %v682_v56 = vld [vmem:[%s1858_s5 + $0x8] sm:$0xff] }
  0x2e   : > { %526 = vrot.lane.b32.xlu2 %v1070_v13, %s1879_s16  ;;  %597 = vmatpush.msra.mxu0 %v555_v41  ;;  %v726_v41 = vld [vmem:[%s1859_s6 + $0x48] sm:$0xff] }
  0x2f   : > { %623 = vmatpush.msra.mxu1 %v568_v58  ;;  %v681_v58 = vld [vmem:[%s1858_s5] sm:$0xff] }
  0x30   : > { %598 = vmatpush.msra.mxu0 %v554_v44  ;;  %v688_v44 = vld [vmem:[%s1858_s5 + $0x38] sm:$0xff] }
  0x31   : > { %624 = vmatpush.msra.mxu1 %v567_v59  ;;  %v717_v59 = vld [vmem:[%s1859_s6] sm:$0xff] }
  0x32   : > { %599 = vmatpush.msra.mxu0 %v553_v46  ;;  %v687_v46 = vld [vmem:[%s1858_s5 + $0x30] sm:$0xff] }
  0x33   : > { %537 = vrot.lane.b32.xlu1 %v536_v23, %s1880_s15  ;;  %402 = vrot.lane.b32.xlu0 %v1320_v2, %s1881_s22 }
  0x34   : > { %600 = vmatpush.msra.mxu0 %v552_v50  ;;  %v685_v50 = vld [vmem:[%s1858_s5 + $0x20] sm:$0xff] }
  0x36   : > { %415 = vrot.lane.b32.xlu2 %v411_v5, %s1879_s16  ;;  %601 = vmatpush.msra.mxu0 %v551_v52  ;;  %v684_v52 = vld [vmem:[%s1858_s5 + $0x18] sm:$0xff] }
  0x3b   : > { %437 = vrot.lane.b32.xlu0 %v434_v25, %s1880_s15  ;;  %447 = vrot.lane.b32.xlu1 %v1067_v9, %s1882_s0 }
  0x3e   : > { %459 = vrot.lane.b32.xlu2 %v455_v12, %s1197_s29 }
  0x43   : > { %481 = vrot.lane.b32.xlu0 %v478_v28, %s1883_s26  ;;  %491 = vrot.lane.b32.xlu1 %v1364_v26, %s1198_s30  ;;  %v632_v26 = vld [vmem:[%s1856_s3] sm:$0xff]  ;;  %v696_v28 = vld [vmem:[%s1858_s5 + $0x78] sm:$0xff] }
  0x46   : > { %519 = vrot.lane.b32.xlu2 %v516_v30, %s1881_s22  ;;  %v695_v30 = vld [vmem:[%s1858_s5 + $0x70] sm:$0xff] }
  0x4b   : > { %528 = vrot.lane.b32.xlu0 %v1071_v16, %s1879_s16  ;;  %539 = vrot.lane.b32.xlu1 %v535_v20, %s1880_s15  ;;  %v1127_v20 = vld [vmem:[%s1855_s2] ss:$0 sm:$0xff]  ;;  %s377_s16 = sand.u32 1, %s1182_s18   ;;  %s1148_s15 = scalar_lea.hbm %s1864_s11, 2 }
  0x4c   : > { %s378_s14 = scalar_lea.vmem [#allocation4], %s377_s16  ;;  %s993_s29 = scalar_lea.sflag [#allocation5], %s377_s16 }
  0x4d   : > { %s1003_s24 = sshll.u32 %s378_s14, 4  ;;  %s1004_s24 = int_to_ptr.vmem [resolvable:$true] %s1003_s24 }
  0x78   : > { %v1393_v37 = vpop.permute.xlu2 %479 }
  0x80   : > { %v458_v48 = vpop.permute.xlu2 %457 }
  0x88   : > { %v527_v57 = vpop.permute.xlu2 %526 }
  0x8d   : > { %v446_v60 = vpop.permute.xlu1 %445  ;;  %v401_v61 = vpop.permute.xlu0 %400 }
  0x8e   : > { %407 = vst.msk [vmem:[#allocation2] sm:$0xff] %vm406_vm6, %v401_v61 }
  0x90   : > { %v416_v62 = vpop.permute.xlu2 %415 }
  0x95   : > { %v436_v63 = vpop.permute.xlu1 %435  ;;  %v414_v0 = vpop.permute.xlu0 %413 }
  0x96   : > { %420 = vst.msk [vmem:[#allocation2] sm:$0xff] %vm419_vm7, %v414_v0 }
  0x97   : > { %429 = vst.msk [vmem:[#allocation2] sm:$0x1] %vm428_vm8, %v1199_v31 }
  0x98   : > { %442 = vst.msk [vmem:[#allocation2] sm:$0xfe] %vm441_vm9, %v436_v63  ;;  %v460_v1 = vpop.permute.xlu2 %459  ;;  %vm467_vm9 = vcmask 778880   ;;  %v754_v63 = vlaneseq }
  0x99   : > { %452 = vst.msk [vmem:[#allocation2] sm:$0xff] %vm451_vm10, %v446_v60 }
  0x9a   : > { %464 = vst.msk [vmem:[#allocation2] sm:$0xff] %vm463_vm11, %v458_v48  ;;  %vm465_vm11 = vcmask 785024   ;;  %v686_v48 = vld [vmem:[%s1858_s5 + $0x28] sm:$0xff] }
  0x9b   : > { %473 = vst.msk [vmem:[#allocation2] sm:$0x1] %vm472_vm12, %v1199_v31  ;;  %vm544_vm12 = vcmask 522624  }
  0x9c   : > { %486 = vst.msk [vmem:[#allocation2] sm:$0xfe] %vm485_vm13, %v1393_v37  ;;  %v728_v37 = vld [vmem:[%s1859_s6 + $0x58] sm:$0xff]  ;;  %vm966_vm13 = vcmask 261120  }
  0x9d   : > { %v518_v2 = vpop.permute.xlu1 %517  ;;  %v490_v3 = vpop.permute.xlu0 %489 }
  0x9e   : > { %524 = vst.msk [vmem:[#allocation2 + $0x8] sm:$0xfe] %vm523_vm15, %v518_v2 }
  0x9f   : > { %496 = vst.msk [vmem:[#allocation2] sm:$0xff] %vm495_vm0, %v490_v3  ;;  %v841_v3 = vld [vmem:[%s1860_s7 + $0x110] sm:$0xff] }
  0xa0   : > { %532 = vst.msk [vmem:[#allocation2 + $0x8] sm:$0xff] %vm419_vm7, %v527_v57  ;;  %v520_v4 = vpop.permute.xlu2 %519  ;;  %v718_v57 = vld [vmem:[%s1859_s6 + $0x8] sm:$0xff] }
  0xa1   : > { %525 = vst.msk [vmem:[#allocation2 + $0x18] sm:$0xff] %vm406_vm6, %v520_v4 }
  0xa5   : > { %v538_v5 = vpop.permute.xlu1 %537  ;;  %v403_v6 = vpop.permute.xlu0 %402 }
  0xa6   : > { %543 = vst.msk [vmem:[#allocation2 + $0x8] sm:$0xff] %vm443_vm1, %v538_v5  ;;  %v547_v7 = vld [vmem:[#allocation2] sm:$0xff] }
  0xa7   : > { %408 = vst.msk [vmem:[#allocation2 + $0x10] sm:$0xff] %vm406_vm6, %v403_v6  ;;  %602 = vmatmul.f32.vlgmr.msra.gmra.mxu0 %v547_v7  ;;  %vm487_vm6 = vcmask 917248  }
  0xa8   : > { %424 = vst.msk [vmem:[#allocation2 + $0x17] sm:$0x1] %vm423_vm2, %v1199_v31 }
  0xa9   : > { %422 = vst.msk [vmem:[#allocation2 + $0x10] sm:$0x7f] %vm421_vm3, %v416_v62 }
  0xad   : > { %v438_v8 = vpop.permute.xlu0 %437  ;;  %v548_v9 = vld [vmem:[#allocation2 + $0x8] sm:$0xff]  ;;  %v448_v10 = vpop.permute.xlu1 %447 }
  0xae   : > { %444 = vst.msk [vmem:[#allocation2 + $0x10] sm:$0xff] %vm443_vm1, %v438_v8  ;;  %1072 = vmatmul.msk.f32.vlgmr.msra.gmra.mxu1 %vm579_vm5, %v548_v9 }
  0xaf   : > { %453 = vst.msk [vmem:[#allocation2 + $0x10] sm:$0xff] %vm451_vm10, %v448_v10 }
  0xb0   : > { %468 = vst.msk [vmem:[#allocation2 + $0x17] sm:$0x1] %vm467_vm9, %v1199_v31 }
  0xb1   : > { %466 = vst.msk [vmem:[#allocation2 + $0x10] sm:$0x7f] %vm465_vm11, %v460_v1 }
  0xb5   : > { %v482_v11 = vpop.permute.xlu0 %481  ;;  %v492_v12 = vpop.permute.xlu1 %491 }
  0xb6   : > { %488 = vst.msk [vmem:[#allocation2 + $0x10] sm:$0xff] %vm487_vm6, %v482_v11  ;;  %v822_v11 = vld [vmem:[%s1860_s7 + $0x78] sm:$0xff] }
  0xb7   : > { %497 = vst.msk [vmem:[#allocation2 + $0x10] sm:$0xff] %vm495_vm0, %v492_v12  ;;  %v838_v12 = vld [vmem:[%s1860_s7 + $0xf8] sm:$0xff]  ;;  %881 = vmatpush.msrb.mxu1 %v822_v11  ;;  %v839_v11 = vld [vmem:[%s1860_s7 + $0x100] sm:$0xff] }
  0xb8   : > { %901 = vmatpush.msrb.mxu0 %v838_v12  ;;  %v855_v12 = vld [vmem:[%s1860_s7 + $0x180] sm:$0xff] }
  0xbd   : > { %v529_v13 = vpop.permute.xlu0 %528  ;;  %v540_v14 = vpop.permute.xlu1 %539 }
  0xbe   : > { %533 = vst.msk [vmem:[#allocation2 + $0x18] sm:$0xff] %vm419_vm7, %v529_v13  ;;  %v549_v15 = vld [vmem:[#allocation2 + $0x10] sm:$0xff]  ;;  %vm766_vm7 = vcmp.ge.s32.totalorder %v754_v63, 64 }
  0xbf   : > { %546 = vst.msk [vmem:[#allocation2 + $0x1f] sm:$0x1] %vm428_vm8, %v1199_v31  ;;  %605 = vmatmul.f32.gmra.mxu0 %v549_v15  ;;  %v731_v31 = vld [vmem:[%s1859_s6 + $0x70] sm:$0xff]  ;;  %v854_v13 = vld [vmem:[%s1860_s7 + $0x178] sm:$0xff]  ;;  %vm767_vm8 = vcmp.lt.s32.totalorder %v754_v63, 128 }
  0xc0   : > { %545 = vst.msk [vmem:[#allocation2 + $0x18] sm:$0x7f] %vm544_vm12, %v540_v14  ;;  %v870_v14 = vld [vmem:[%s1860_s7 + $0x1f8] sm:$0xff]  ;;  %v821_v15 = vld [vmem:[%s1860_s7 + $0x70] sm:$0xff]  ;;  %vm1635_vm10 = vmand %vm766_vm7, %vm767_vm8 }
  0xc1   : > { %882 = vmatpush.msrb.mxu1 %v821_v15 }
  0xc7   : > { %v550_v16 = vld [vmem:[#allocation2 + $0x18] sm:$0xff] }
  0xc8   : > { %1073 = vmatmul.msk.f32.gmra.mxu1 %vm579_vm5, %v550_v16  ;;  %v837_v16 = vld [vmem:[%s1860_s7 + $0xf0] sm:$0xff] }
  0xc9   : > { %902 = vmatpush.msrb.mxu0 %v837_v16 }
 0x124   : > { %v603_v17 = vpop.f32.mrf.mxu0 }
 0x125   : > { %v604_v23 = vadd.f32 %v1127_v20, %v603_v17  ;;  %v853_v17 = vld [vmem:[%s1860_s7 + $0x170] sm:$0xff] }
 0x12b   : > { %v626_v18 = vpop.f32.mrf.mxu1 }
 0x12c   : > { %v627_v25 = vadd.f32 %v626_v18, %v604_v23  ;;  %v869_v18 = vld [vmem:[%s1860_s7 + $0x1f0] sm:$0xff]  ;;  %v962_v23 = vld [vmem:[%s1862_s9 + $0x8] sm:$0xff] }
 0x13c   : > { %v606_v19 = vpop.f32.mrf.mxu0 }
 0x13d   : > { %v607_v21 = vadd.f32 %v1127_v20, %v606_v19  ;;  %v820_v19 = vld [vmem:[%s1860_s7 + $0x68] sm:$0xff] }
 0x13e   : > { %v836_v20 = vld [vmem:[%s1860_s7 + $0xe8] sm:$0xff]  ;;  %883 = vmatpush.msrb.mxu1 %v820_v19 }
 0x13f   : > { %903 = vmatpush.msrb.mxu0 %v836_v20 }
 0x145   : > { %v629_v22 = vpop.f32.mrf.mxu1 }
 0x146   : > { %v630_v24 = vadd.f32 %v629_v22, %v607_v21  ;;  %v852_v21 = vld [vmem:[%s1860_s7 + $0x168] sm:$0xff] }
 0x147   : > { %v868_v22 = vld [vmem:[%s1860_s7 + $0x1e8] sm:$0xff] }
 0x148   : > { %650 = vmatpush.msra.mxu2 %v630_v24  ;;  %674 = vmatpush.msra.mxu3 %v630_v24 }
 0x14a   : > { %651 = vmatpush.msra.mxu2 %v627_v25  ;;  %675 = vmatpush.msra.mxu3 %v627_v25  ;;  %v819_v25 = vld [vmem:[%s1860_s7 + $0x60] sm:$0xff] }
 0x14b   : > { %1074 = vmatmul.msk.f32.vlgmr.msra.gmra.mxu2 %vm398_vm4, %v632_v26  ;;  %1075 = vmatmul.msk.f32.vlgmr.msra.gmra.mxu3 %vm398_vm4, %v656_v27  ;;  %vm1583_vm4 = vcmp.lt.s32.totalorder %v754_v63, 64  ;;  %v835_v26 = vld [vmem:[%s1860_s7 + $0xe0] sm:$0xff]  ;;  %v842_v63 = vld [vmem:[%s1860_s7 + $0x118] sm:$0xff] }
 0x14c   : > { %697 = vmatpush.msrb.mxu2 %v696_v28  ;;  %733 = vmatpush.msrb.mxu3 %v732_v29  ;;  %v851_v27 = vld [vmem:[%s1860_s7 + $0x160] sm:$0xff]  ;;  %v818_v29 = vld [vmem:[%s1860_s7 + $0x58] sm:$0xff] }
 0x14d   : > { %884 = vmatpush.msrb.mxu1 %v819_v25  ;;  %904 = vmatpush.msrb.mxu0 %v835_v26  ;;  %v867_v28 = vld [vmem:[%s1860_s7 + $0x1e0] sm:$0xff] }
 0x14e   : > { %698 = vmatpush.msrb.mxu2 %v695_v30  ;;  %734 = vmatpush.msrb.mxu3 %v731_v31  ;;  %v834_v30 = vld [vmem:[%s1860_s7 + $0xd8] sm:$0xff]  ;;  %v871_v25 = vld [vmem:[%s1861_s8] sm:$0x1] }
 0x14f   : > { %v850_v31 = vld [vmem:[%s1860_s7 + $0x158] sm:$0xff]  ;;  %885 = vmatpush.msrb.mxu1 %v818_v29  ;;  %905 = vmatpush.msrb.mxu0 %v834_v30 }
 0x150   : > { %699 = vmatpush.msrb.mxu2 %v694_v32  ;;  %735 = vmatpush.msrb.mxu3 %v730_v33  ;;  %v866_v32 = vld [vmem:[%s1860_s7 + $0x1d8] sm:$0xff]  ;;  %v817_v33 = vld [vmem:[%s1860_s7 + $0x50] sm:$0xff] }
 0x151   : > { %886 = vmatpush.msrb.mxu1 %v817_v33 }
 0x152   : > { %700 = vmatpush.msrb.mxu2 %v693_v34  ;;  %736 = vmatpush.msrb.mxu3 %v729_v35  ;;  %v833_v34 = vld [vmem:[%s1860_s7 + $0xd0] sm:$0xff] }
 0x153   : > { %v849_v35 = vld [vmem:[%s1860_s7 + $0x150] sm:$0xff]  ;;  %906 = vmatpush.msrb.mxu0 %v833_v34  ;;  %v965_v34 = vld [vmem:[%s1863_s10] sm:$0x1] }
 0x154   : > { %701 = vmatpush.msrb.mxu2 %v692_v36  ;;  %737 = vmatpush.msrb.mxu3 %v728_v37  ;;  %v865_v36 = vld [vmem:[%s1860_s7 + $0x1d0] sm:$0xff]  ;;  %v816_v37 = vld [vmem:[%s1860_s7 + $0x48] sm:$0xff] }
 0x155   : > { %887 = vmatpush.msrb.mxu1 %v816_v37 }
 0x156   : > { %702 = vmatpush.msrb.mxu2 %v691_v38  ;;  %738 = vmatpush.msrb.mxu3 %v727_v39  ;;  %v832_v38 = vld [vmem:[%s1860_s7 + $0xc8] sm:$0xff] }
 0x157   : > { %v848_v39 = vld [vmem:[%s1860_s7 + $0x148] sm:$0xff]  ;;  %907 = vmatpush.msrb.mxu0 %v832_v38 }
 0x158   : > { %703 = vmatpush.msrb.mxu2 %v690_v40  ;;  %739 = vmatpush.msrb.mxu3 %v726_v41  ;;  %v864_v40 = vld [vmem:[%s1860_s7 + $0x1c8] sm:$0xff]  ;;  %v815_v41 = vld [vmem:[%s1860_s7 + $0x40] sm:$0xff] }
 0x159   : > { %888 = vmatpush.msrb.mxu1 %v815_v41 }
 0x15a   : > { %704 = vmatpush.msrb.mxu2 %v689_v42  ;;  %740 = vmatpush.msrb.mxu3 %v725_v43  ;;  %v831_v42 = vld [vmem:[%s1860_s7 + $0xc0] sm:$0xff] }
 0x15b   : > { %v847_v43 = vld [vmem:[%s1860_s7 + $0x140] sm:$0xff]  ;;  %908 = vmatpush.msrb.mxu0 %v831_v42 }
 0x15c   : > { %705 = vmatpush.msrb.mxu2 %v688_v44  ;;  %741 = vmatpush.msrb.mxu3 %v724_v45  ;;  %v863_v44 = vld [vmem:[%s1860_s7 + $0x1c0] sm:$0xff]  ;;  %v814_v45 = vld [vmem:[%s1860_s7 + $0x38] sm:$0xff] }
 0x15d   : > { %889 = vmatpush.msrb.mxu1 %v814_v45 }
 0x15e   : > { %706 = vmatpush.msrb.mxu2 %v687_v46  ;;  %742 = vmatpush.msrb.mxu3 %v723_v47  ;;  %v830_v46 = vld [vmem:[%s1860_s7 + $0xb8] sm:$0xff] }
 0x15f   : > { %v846_v47 = vld [vmem:[%s1860_s7 + $0x138] sm:$0xff]  ;;  %909 = vmatpush.msrb.mxu0 %v830_v46 }
 0x160   : > { %707 = vmatpush.msrb.mxu2 %v686_v48  ;;  %743 = vmatpush.msrb.mxu3 %v722_v49  ;;  %v862_v48 = vld [vmem:[%s1860_s7 + $0x1b8] sm:$0xff]  ;;  %v813_v49 = vld [vmem:[%s1860_s7 + $0x30] sm:$0xff] }
 0x161   : > { %890 = vmatpush.msrb.mxu1 %v813_v49 }
 0x162   : > { %708 = vmatpush.msrb.mxu2 %v685_v50  ;;  %744 = vmatpush.msrb.mxu3 %v721_v51  ;;  %v829_v50 = vld [vmem:[%s1860_s7 + $0xb0] sm:$0xff] }
 0x163   : > { %v845_v51 = vld [vmem:[%s1860_s7 + $0x130] sm:$0xff]  ;;  %910 = vmatpush.msrb.mxu0 %v829_v50 }
 0x164   : > { %709 = vmatpush.msrb.mxu2 %v684_v52  ;;  %745 = vmatpush.msrb.mxu3 %v720_v53  ;;  %v861_v52 = vld [vmem:[%s1860_s7 + $0x1b0] sm:$0xff]  ;;  %v812_v53 = vld [vmem:[%s1860_s7 + $0x28] sm:$0xff] }
 0x165   : > { %891 = vmatpush.msrb.mxu1 %v812_v53 }
 0x166   : > { %710 = vmatpush.msrb.mxu2 %v683_v54  ;;  %746 = vmatpush.msrb.mxu3 %v719_v55  ;;  %v828_v54 = vld [vmem:[%s1860_s7 + $0xa8] sm:$0xff] }
 0x167   : > { %v844_v55 = vld [vmem:[%s1860_s7 + $0x128] sm:$0xff]  ;;  %911 = vmatpush.msrb.mxu0 %v828_v54 }
 0x168   : > { %711 = vmatpush.msrb.mxu2 %v682_v56  ;;  %747 = vmatpush.msrb.mxu3 %v718_v57  ;;  %v860_v56 = vld [vmem:[%s1860_s7 + $0x1a8] sm:$0xff]  ;;  %v811_v57 = vld [vmem:[%s1860_s7 + $0x20] sm:$0xff] }
 0x169   : > { %892 = vmatpush.msrb.mxu1 %v811_v57 }
 0x16a   : > { %712 = vmatpush.msrb.mxu2 %v681_v58  ;;  %748 = vmatpush.msrb.mxu3 %v717_v59  ;;  %v827_v58 = vld [vmem:[%s1860_s7 + $0xa0] sm:$0xff] }
 0x16b   : > { %v843_v59 = vld [vmem:[%s1860_s7 + $0x120] sm:$0xff]  ;;  %912 = vmatpush.msrb.mxu0 %v827_v58 }
 0x16c   : > { %921 = vmatpush.msra.mxu2 %v854_v13  ;;  %941 = vmatpush.msra.mxu3 %v870_v14 }
 0x16e   : > { %922 = vmatpush.msra.mxu2 %v853_v17  ;;  %942 = vmatpush.msra.mxu3 %v869_v18 }
 0x170   : > { %923 = vmatpush.msra.mxu2 %v852_v21  ;;  %943 = vmatpush.msra.mxu3 %v868_v22  ;;  %v964_v21 = vld [vmem:[%s1862_s9 + $0x18] sm:$0xff]  ;;  %v963_v22 = vld [vmem:[%s1862_s9 + $0x10] sm:$0xff] }
 0x172   : > { %924 = vmatpush.msra.mxu2 %v851_v27  ;;  %944 = vmatpush.msra.mxu3 %v867_v28 }
 0x174   : > { %925 = vmatpush.msra.mxu2 %v850_v31  ;;  %945 = vmatpush.msra.mxu3 %v866_v32 }
 0x176   : > { %926 = vmatpush.msra.mxu2 %v849_v35  ;;  %946 = vmatpush.msra.mxu3 %v865_v36 }
 0x178   : > { %927 = vmatpush.msra.mxu2 %v848_v39  ;;  %947 = vmatpush.msra.mxu3 %v864_v40 }
 0x17a   : > { %928 = vmatpush.msra.mxu2 %v847_v43  ;;  %948 = vmatpush.msra.mxu3 %v863_v44 }
 0x17c   : > { %929 = vmatpush.msra.mxu2 %v846_v47  ;;  %949 = vmatpush.msra.mxu3 %v862_v48 }
 0x17e   : > { %930 = vmatpush.msra.mxu2 %v845_v51  ;;  %950 = vmatpush.msra.mxu3 %v861_v52 }
 0x180   : > { %931 = vmatpush.msra.mxu2 %v844_v55  ;;  %951 = vmatpush.msra.mxu3 %v860_v56 }
 0x182   : > { %932 = vmatpush.msra.mxu2 %v843_v59 }
 0x184   : > { %933 = vmatpush.msra.mxu2 %v842_v63 }
 0x186   : > { %934 = vmatpush.msra.mxu2 %v841_v3 }
 0x1ce   : > { %v653_v60 = vpop.f32.mrf.mxu2  ;;  %v677_v61 = vpop.f32.mrf.mxu3 }
 0x1cf   : > { %v680_v62 = vmax.f32 %v653_v60, %v677_v61  ;;  %v859_v60 = vld [vmem:[%s1860_s7 + $0x1a0] sm:$0xff]  ;;  %v810_v61 = vld [vmem:[%s1860_s7 + $0x18] sm:$0xff] }
 0x1d0   : > { %952 = vmatpush.msra.mxu3 %v859_v60  ;;  %893 = vmatpush.msrb.mxu1 %v810_v61 }
 0x1d1   : > { %713 = vmatmul.f32.vlgmr.msrb.gmra.mxu2 %v680_v62  ;;  %749 = vmatmul.f32.vlgmr.msrb.gmra.mxu3 %v680_v62  ;;  %v826_v62 = vld [vmem:[%s1860_s7 + $0x98] sm:$0xff] }
 0x1d2   : > { %913 = vmatpush.msrb.mxu0 %v826_v62 }
 0x254   : > { %v714_v0 = vpop.f32.mrf.mxu2  ;;  %v750_v1 = vpop.f32.mrf.mxu3 }
 0x255   : > { %v753_v2 = vmax.f32 %v714_v0, %v750_v1  ;;  %v858_v0 = vld [vmem:[%s1860_s7 + $0x198] sm:$0xff]  ;;  %v809_v1 = vld [vmem:[%s1860_s7 + $0x10] sm:$0xff] }
 0x256   : > { %953 = vmatpush.msra.mxu3 %v858_v0  ;;  %894 = vmatpush.msrb.mxu1 %v809_v1 }
 0x257   : > { %760 = vst [vmem:[#allocation1] sm:$0xff] %v753_v2 }
 0x258   : > { %758 = vst.msk [vmem:[#allocation3] sm:$0x1] %vm1583_vm4, %v753_v2 }
 0x25e   : > { %v762_v4 = vld [vmem:[#allocation1 + $0x1] ss:$9 sm:$0xff] }
 0x25f   : > { %763 = vrot.lane.b32.xlu2 %v762_v4, %s1882_s0  ;;  %770 = vst [vmem:[#allocation1] sm:$0xff] %v753_v2  ;;  %v857_v4 = vld [vmem:[%s1860_s7 + $0x190] sm:$0xff] }
 0x260   : > { %954 = vmatpush.msra.mxu3 %v857_v4 }
 0x266   : > { %v772_v5 = vld [vmem:[#allocation1 + $0x2] ss:$9 sm:$0xff] }
 0x267   : > { %775 = vst [vmem:[#allocation1] sm:$0xff] %v753_v2 }
 0x268   : > { %774 = vst.msk [vmem:[#allocation3 + $0x1] sm:$0x1] %vm1583_vm4, %v772_v5  ;;  %v808_v5 = vld [vmem:[%s1860_s7 + $0x8] sm:$0xff] }
 0x269   : > { %895 = vmatpush.msrb.mxu1 %v808_v5 }
 0x26e   : > { %v777_v6 = vld [vmem:[#allocation1 + $0x3] ss:$9 sm:$0xff] }
 0x26f   : > { %778 = vrot.lane.b32.xlu0 %v777_v6, %s1882_s0  ;;  %782 = vst [vmem:[#allocation1] sm:$0xff] %v753_v2  ;;  %v824_v6 = vld [vmem:[%s1860_s7 + $0x88] sm:$0xff] }
 0x276   : > { %v784_v7 = vld [vmem:[#allocation1 + $0x4] ss:$9 sm:$0xff] }
 0x277   : > { %787 = vst [vmem:[#allocation1] sm:$0xff] %v753_v2 }
 0x278   : > { %786 = vst.msk [vmem:[#allocation3 + $0x2] sm:$0x1] %vm1583_vm4, %v784_v7  ;;  %v840_v7 = vld [vmem:[%s1860_s7 + $0x108] sm:$0xff] }
 0x279   : > { %935 = vmatpush.msra.mxu2 %v840_v7 }
 0x27b   : > { %936 = vmatpush.msra.mxu2 %v839_v11 }
 0x27e   : > { %v789_v8 = vld [vmem:[#allocation1 + $0x5] ss:$9 sm:$0xff] }
 0x27f   : > { %790 = vrot.lane.b32.xlu1 %v789_v8, %s1882_s0  ;;  %794 = vst [vmem:[#allocation1] sm:$0xff] %v753_v2  ;;  %v856_v8 = vld [vmem:[%s1860_s7 + $0x188] sm:$0xff] }
 0x280   : > { %955 = vmatpush.msra.mxu3 %v856_v8 }
 0x282   : > { %956 = vmatpush.msra.mxu3 %v855_v12 }
 0x286   : > { %v796_v9 = vld [vmem:[#allocation1 + $0x6] ss:$9 sm:$0xff] }
 0x287   : > { %799 = vst [vmem:[#allocation1] sm:$0xff] %v753_v2  ;;  %v825_v2 = vld [vmem:[%s1860_s7 + $0x90] sm:$0xff] }
 0x288   : > { %798 = vst.msk [vmem:[#allocation3 + $0x3] sm:$0x1] %vm1583_vm4, %v796_v9  ;;  %914 = vmatpush.msrb.mxu0 %v825_v2  ;;  %v807_v9 = vld [vmem:[%s1860_s7] sm:$0xff] }
 0x289   : > { %896 = vmatpush.msrb.mxu1 %v807_v9 }
 0x28a   : > { %915 = vmatpush.msrb.mxu0 %v824_v6 }
 0x28b   : > { %982 = vmatpush.msra.mxu1 %v964_v21 }
 0x28d   : > { %983 = vmatpush.msra.mxu1 %v963_v22 }
 0x28e   : > { %v801_v10 = vld [vmem:[#allocation1 + $0x7] ss:$9 sm:$0xff] }
 0x28f   : > { %802 = vrot.lane.b32.xlu2 %v801_v10, %s1882_s0  ;;  %v823_v10 = vld [vmem:[%s1860_s7 + $0x80] sm:$0xff]  ;;  %984 = vmatpush.msra.mxu1 %v962_v23  ;;  %s1001_s0 = scalar_lea.hbm %s1864_s11, %s1281_s21 }
 0x290   : > { %916 = vmatpush.msrb.mxu0 %v823_v10  ;;  %s1005_s25 = sshll.u32 %s1001_s0, 4  ;;  %s1006_s25 = int_to_ptr.hbm [resolvable:$true] %s1005_s25 }
 0x291   : > { %s1142_s30 = sshra.s32 %s1006_s25, 4  ;;  %s1143_s30 = int_to_ptr.hbm [resolvable:$true] %s1142_s30 }
 0x292   : > { %s1144_s12 = scalar_lea.hbm %s1143_s30, 1  ;;  %p1149_p0 = scmp.lt.s32.totalorder %s1143_s30, %s1864_s11 }
 0x293   : > { %p1145_p11 = scmp.ne.s32.totalorder %s1143_s30, %s1144_s12  ;;  %p1150_p1 = scmp.lt.s32.totalorder %s1148_s15, %s1144_s12 }
 0x295   : > { %p1146_p12 = pnand %p1145_p11, %p1298_p5  ;;  %p1151_p2 = por %p1150_p1, %p1149_p0 }
 0x297   : > { %p1147_p13 = pneg %p1146_p12 }
 0x299   : > { %p1152_p3 = pnand %p1151_p2, %p1147_p13 }
 0x2b9   : > { %v764_v24 = vpop.permute.xlu2 %763 }
 0x2ba   : > { %769 = vst.msk [vmem:[#allocation3] sm:$0x1] %vm1635_vm10, %v764_v24  ;;  %v961_v24 = vld [vmem:[%s1862_s9] sm:$0xff] }
 0x2bb   : > { %985 = vmatpush.msra.mxu1 %v961_v24 }
 0x2e1   : > { %v779_v13 = vpop.permute.xlu0 %778 }
 0x2e2   : > { %781 = vst.msk [vmem:[#allocation3 + $0x1] sm:$0x1] %vm1635_vm10, %v779_v13 }
 0x2e9   : > { %v803_v14 = vpop.permute.xlu2 %802 }
 0x2ea   : > { %805 = vst.msk [vmem:[#allocation3 + $0x3] sm:$0x1] %vm1635_vm10, %v803_v14 }
 0x2f1   : > { %v791_v15 = vpop.permute.xlu1 %790 }
 0x2f2   : > { %793 = vst.msk [vmem:[#allocation3 + $0x2] sm:$0x1] %vm1635_vm10, %v791_v15 }
 0x2f9   : > { %v806_v16 = vld [vmem:[#allocation3] sm:$0xf] }
 0x2fa   : > { %v873_v17 = vperm.slane %v806_v16, 0  ;;  %v874_v18 = vperm.slane %v806_v16, 1  ;;  %v875_v19 = vperm.slane %v806_v16, 2  ;;  %v876_v20 = vperm.slane %v806_v16, 3 }
 0x2fc   : > { %897 = vmatmul.f32.vlgmr.msrb.gmra.mxu1 %v873_v17  ;;  %917 = vmatmul.f32.vlgmr.msrb.gmra.mxu0 %v874_v18 }
 0x2fd   : > { %937 = vmatmul.f32.vlgmr.msra.gmra.mxu2 %v875_v19  ;;  %957 = vmatmul.f32.vlgmr.msra.gmra.mxu3 %v876_v20 }
 0x379   : > { %v898_v26 = vpop.f32.mrf.mxu1  ;;  %v918_v28 = vpop.f32.mrf.mxu0 }
 0x37a   : > { %v899_v27 = vadd.f32 %v898_v26, %v871_v25 }
 0x37c   : > { %v919_v29 = vadd.f32 %v918_v28, %v899_v27 }
 0x380   : > { %v938_v30 = vpop.f32.mrf.mxu2  ;;  %v958_v32 = vpop.f32.mrf.mxu3 }
 0x381   : > { %v939_v31 = vadd.f32 %v938_v30, %v919_v29 }
 0x383   : > { %v959_v33 = vadd.f32 %v958_v32, %v939_v31 }
 0x385   : > { %1076 = vmatmul.msk.f32.vlgmr.msra.gmra.mxu1 %vm966_vm13, %v959_v33 }
 0x402   : > { %v987_v35 = vpop.f32.mrf.mxu1 }
 0x403   : > { %v988_v36 = vadd.f32 %v987_v35, %v965_v34 }
 0x405   : > { %991 = vst.msk [vmem:[%s378_s14] sm:$0x1] %vm990_vm14, %v988_v36 }
 0x406   : > { %1155 = shalt.err (!%p1152_p3)
}
 0x407   : > { %1080 = dma.vmem_to_hbm [thread:$0]  (%p1298_p5), %s1004_s24, 16, %s1006_s25, %s993_s29  }
 0x408 PF: > { %p1086_p4 = scmp.ge.s32.totalorder %s1190_s20, 2  ;;  %s1017_s16 = sand.u32 1, %s1178_s17  }
 0x409   : > { %s1018_s26 = scalar_lea.sflag [#allocation5], %s1017_s16 }
 0x40a   : > { %p1083_p7 = pnand %p1086_p4, %p1302_p6 }
 0x40c   : > { %p1084_p8 = pneg %p1083_p7 }
 0x40e   : > { %1173 = dma.done.wait (%p1084_p8), %s1018_s26, 16  }
 0x40f   : > { %1175 = vsyncadd (%p1084_p8), %s1018_s26, 4294967280  ;;  %s1888_s14 = sld [smem:[#allocation7_spill]]  ;;  %p21_p9 = scmp.ge.s32.totalorder %s1285_s23, 4  }
 0x410   : > { %s1889_s17 = smov %s1182_s18  ;;  %s1890_s18 = smov %s1186_s19 }
 0x411   : > { %s1892_s20 = smov %s1285_s23  ;;  %23 = sbr.rel (!%p21_p9) target bundleno = 5 (0x5), region = 109 }
 0x415   : > { %s1891_s19 = smov %s1888_s14 }
 0x416   :  { %1023 = vsyncpa [#allocation5], 1 }
 0x417   :  { %1025 = vsyncpa [#allocation5 + $0x1], 1 }

</bundles_post_ra>
